<compile_context>
chip_gen: v6e
topology: v6e:2x2x1
jax: 0.10.0
libtpu: 0.0.40
codegen_flags: <defaults>
</compile_context>

<pallas_src>
import jax
import jax.numpy as jnp
from jax.experimental import pallas as pl
from jax.experimental.pallas import tpu as pltpu


def _correct_count_kernel(logits_ref, targets_ref, out_ref, acc_ref):
    i = pl.program_id(1)

    @pl.when(i == 0)
    def _():
        acc_ref[...] = jnp.zeros_like(acc_ref)

    x = logits_ref[...].astype(jnp.float32)       # (TB, C)
    t = targets_ref[...]                          # (TB, 1) int32

    # argmax along the class (lane) axis, first-max-index tie-breaking.
    m = jnp.max(x, axis=1, keepdims=True)                         # (TB, 1)
    cls_idx = jax.lax.broadcasted_iota(jnp.int32, x.shape, 1)     # (TB, C)
    big = jnp.iinfo(jnp.int32).max
    pred = jnp.min(jnp.where(x == m, cls_idx, big), axis=1, keepdims=True)

    correct = (pred == t).astype(jnp.float32)                     # (TB, 1)
    partial = jnp.sum(correct, axis=0, keepdims=True)             # (1, 1)

    # One unmasked full-vreg accumulate per step (every element of the scratch
    # carries the running per-core count).
    acc_ref[...] += jnp.broadcast_to(partial, acc_ref.shape)

    @pl.when(i == pl.num_programs(1) - 1)
    def _():
        # Single lane-dense output-block store per core.
        out_ref[...] = acc_ref[...]


def custom_loss(logits, targets, *, tile_b=None, num_cores=2):
    """Pallas implementation of CustomLoss.forward.

    Args:
      logits:  (B, C) float array.
      targets: (B,) or (B, 1) integer array of class labels.
    Returns:
      scalar float32 loss value.
    """
    B, C = logits.shape
    tgt = targets.reshape(B, 1).astype(jnp.int32)

    # --- tile size from an explicit VMEM budget ---------------------------
    # Double-buffered, lane-padded VMEM cost per batch row:
    #   logits : 2 * 4 * round_up(C, 128) bytes
    #   targets: 2 * 4 * 128 bytes           ((tile_b, 1) pads to 128 lanes)
    lane_pad_c = pl.cdiv(C, 128) * 128
    vmem_budget = 16 * 1024 * 1024            # safe on v5e / v6e / v7x
    bytes_per_row = 2 * 4 * (lane_pad_c + 128)
    if tile_b is None:
        tile_b = (vmem_budget // bytes_per_row) // 8 * 8
        tile_b = int(max(8, min(2048, tile_b)))

    rows_per_core = pl.cdiv(pl.cdiv(B, num_cores), 8) * 8
    tile_b = min(tile_b, rows_per_core)
    tiles_per_core = pl.cdiv(rows_per_core, tile_b)
    padded_b = num_cores * tiles_per_core * tile_b

    # Pad the batch so it tiles evenly; padded rows get target -1, which can
    # never match an argmax in [0, C), so they contribute nothing.
    pad = padded_b - B
    if pad:
        logits_p = jnp.pad(logits, ((0, pad), (0, 0)))
        tgt_p = jnp.pad(tgt, ((0, pad), (0, 0)), constant_values=-1)
    else:
        logits_p, tgt_p = logits, tgt

    T = tiles_per_core
    counts = pl.pallas_call(
        _correct_count_kernel,
        out_shape=jax.ShapeDtypeStruct((num_cores, 8, 128), jnp.float32),
        grid_spec=pltpu.PrefetchScalarGridSpec(
            num_scalar_prefetch=0,
            grid=(num_cores, T),
            in_specs=[
                pl.BlockSpec((tile_b, C), lambda c, i: (c * T + i, 0)),
                pl.BlockSpec((tile_b, 1), lambda c, i: (c * T + i, 0)),
            ],
            out_specs=pl.BlockSpec((None, 8, 128), lambda c, i: (c, 0, 0)),
            scratch_shapes=[pltpu.VMEM((8, 128), jnp.float32)],
        ),
        compiler_params=pltpu.CompilerParams(
            dimension_semantics=("parallel", "arbitrary"),
            vmem_limit_bytes=32 * 1024 * 1024,
        ),
    )(logits_p, tgt_p)

    n_correct = jnp.sum(counts[:, 0, 0])
    # Exact algebraic identity: sum_c (1 - softmax(x)_c) == C - 1.
    return (n_correct * jnp.float32(C - 1)) / jnp.float32(B)


def _reference_loss(logits, targets):
    """Pure-JAX reference mirroring the PyTorch module exactly."""
    B = logits.shape[0]
    pred = jnp.argmax(logits, axis=1, keepdims=True)
    probs = jax.nn.softmax(logits, axis=1)
    correct = (pred == targets.reshape(pred.shape)).astype(logits.dtype)
    n_correct = jnp.sum((1.0 - probs) * correct)
    return n_correct / B


if __name__ == "__main__":
    key = jax.random.PRNGKey(0)
    k1, k2 = jax.random.split(key)

    B, C = 64, 16  # small synthetic shapes: batch=64, nb_classes=16
    logits = jax.random.normal(k1, (B, C), dtype=jnp.float32)
    targets = jax.random.randint(k2, (B,), 0, C, dtype=jnp.int32)

    loss = custom_loss(logits, targets)
    loss = jax.block_until_ready(loss)

    ref = _reference_loss(logits, targets)
    assert jnp.allclose(loss, ref, rtol=1e-5, atol=1e-5), (loss, ref)

    print("KERNEL_OK")
</pallas_src>

<mosaic_0001>
module attributes {stable_mosaic.version = 11 : i64} {
  func.func @_correct_count_kernel(%arg0: i32, %arg1: i32, %arg2: memref<32x16xf32, #tpu.memory_space<vmem>>, %arg3: memref<32x1xi32, #tpu.memory_space<vmem>>, %arg4: memref<1x8x128xf32, #tpu.memory_space<vmem>>, %arg5: memref<8x128xf32, #tpu.memory_space<vmem>>) attributes {dimension_semantics = [#tpu.dimension_semantics<parallel>, #tpu.dimension_semantics<arbitrary>], iteration_bounds = array<i64: 2, 1>, scalar_prefetch = 0 : i64, scratch_operands = 1 : i64, tpu.core_type = #tpu.core_type<tc>, window_params = [{transform_indices = @transform_0, window_bounds = array<i64: 32, 16>}, {transform_indices = @transform_1, window_bounds = array<i64: 32, 1>}, {transform_indices = @transform_2, window_bounds = array<i64: 1, 8, 128>}]} {
    %c0_i32 = arith.constant 0 : i32
    %0 = arith.cmpi eq, %arg1, %c0_i32 : i32
    %1 = arith.extui %0 : i1 to i32
    %c0_i32_0 = arith.constant 0 : i32
    %2 = arith.cmpi ne, %1, %c0_i32_0 : i32
    scf.if %2 {
      %cst_12 = arith.constant 0.000000e+00 : f32
      %27 = vector.broadcast %cst_12 : f32 to vector<8x128xf32>
      %c0_13 = arith.constant 0 : index
      %c0_14 = arith.constant 0 : index
      %28 = vector.load %arg5[%c0_13, %c0_14] : memref<8x128xf32, #tpu.memory_space<vmem>>, vector<8x128xf32>
      tpu.vector_store %arg5[%c0_13, %c0_14], %27 {strides = array<i32>} : memref<8x128xf32, #tpu.memory_space<vmem>>, vector<8x128xf32>,
    } else {
    }
    %c0 = arith.constant 0 : index
    %c0_1 = arith.constant 0 : index
    %3 = vector.load %arg2[%c0, %c0_1] : memref<32x16xf32, #tpu.memory_space<vmem>>, vector<32x16xf32>
    %c0_2 = arith.constant 0 : index
    %c0_3 = arith.constant 0 : index
    %4 = vector.load %arg3[%c0_2, %c0_3] : memref<32x1xi32, #tpu.memory_space<vmem>>, vector<32x1xi32>
    %cst = arith.constant dense<0xFF800000> : vector<32xf32>
    %5 = vector.multi_reduction <maximumf>, %3, %cst [1] : vector<32x16xf32> to vector<32xf32>
    %6 = vector.shape_cast %5 : vector<32xf32> to vector<32x1xf32>
    %7 = tpu.iota {dimensions = array<i32: 1>} : vector<32x16xi32>
    %8 = vector.broadcast %6 : vector<32x1xf32> to vector<32x16xf32>
    %9 = arith.cmpf oeq, %3, %8 : vector<32x16xf32>
    %c2147483647_i32 = arith.constant 2147483647 : i32
    %10 = vector.broadcast %c2147483647_i32 : i32 to vector<32x16xi32>
    %11 = arith.select %9, %7, %10 : vector<32x16xi1>, vector<32x16xi32>
    %cst_4 = arith.constant dense<2147483647> : vector<32xi32>
    %12 = vector.multi_reduction <minsi>, %11, %cst_4 [1] : vector<32x16xi32> to vector<32xi32>
    %13 = vector.shape_cast %12 : vector<32xi32> to vector<32x1xi32>
    %14 = arith.cmpi eq, %13, %4 : vector<32x1xi32>
    %15 = arith.extui %14 : vector<32x1xi1> to vector<32x1xi32>
    %16 = arith.sitofp %15 : vector<32x1xi32> to vector<32x1xf32>
    %cst_5 = arith.constant dense<0.000000e+00> : vector<1xf32>
    %17 = vector.multi_reduction <add>, %16, %cst_5 [0] : vector<32x1xf32> to vector<1xf32>
    %18 = vector.shape_cast %17 : vector<1xf32> to vector<1x1xf32>
    %c0_6 = arith.constant 0 : index
    %c0_7 = arith.constant 0 : index
    %19 = vector.load %arg5[%c0_6, %c0_7] : memref<8x128xf32, #tpu.memory_space<vmem>>, vector<8x128xf32>
    %20 = vector.shape_cast %18 : vector<1x1xf32> to vector<1x1xf32>
    %21 = vector.broadcast %20 : vector<1x1xf32> to vector<8x128xf32>
    %22 = arith.addf %19, %21 : vector<8x128xf32>
    %c0_8 = arith.constant 0 : index
    %c0_9 = arith.constant 0 : index
    %23 = vector.load %arg5[%c0_8, %c0_9] : memref<8x128xf32, #tpu.memory_space<vmem>>, vector<8x128xf32>
    tpu.vector_store %arg5[%c0_8, %c0_9], %22 {strides = array<i32>} : memref<8x128xf32, #tpu.memory_space<vmem>>, vector<8x128xf32>,
    %c0_i32_10 = arith.constant 0 : i32
    %24 = arith.cmpi eq, %arg1, %c0_i32_10 : i32
    %25 = arith.extui %24 : i1 to i32
    %c0_i32_11 = arith.constant 0 : i32
    %26 = arith.cmpi ne, %25, %c0_i32_11 : i32
    scf.if %26 {
      %c0_12 = arith.constant 0 : index
      %c0_13 = arith.constant 0 : index
      %27 = vector.load %arg5[%c0_12, %c0_13] : memref<8x128xf32, #tpu.memory_space<vmem>>, vector<8x128xf32>
      %c0_14 = arith.constant 0 : index
      %c0_15 = arith.constant 0 : index
      %c0_16 = arith.constant 0 : index
      %28 = vector.load %arg4[%c0_14, %c0_15, %c0_16] : memref<1x8x128xf32, #tpu.memory_space<vmem>>, vector<1x8x128xf32>
      %29 = vector.shape_cast %28 : vector<1x8x128xf32> to vector<8x128xf32>
      %30 = vector.shape_cast %27 : vector<8x128xf32> to vector<1x8x128xf32>
      tpu.vector_store %arg4[%c0_14, %c0_15, %c0_16], %30 {strides = array<i32>} : memref<1x8x128xf32, #tpu.memory_space<vmem>>, vector<1x8x128xf32>,
    } else {
    }
    return
  }
  func.func @transform_0(%arg0: i32, %arg1: i32) -> (i32, i32) {
    %c1_i32 = arith.constant 1 : i32
    %0 = arith.muli %arg0, %c1_i32 : i32
    %1 = arith.addi %0, %arg1 : i32
    %c0_i32 = arith.constant 0 : i32
    %c0_i32_0 = arith.constant 0 : i32
    return %1, %c0_i32 : i32, i32
  }
  func.func @transform_1(%arg0: i32, %arg1: i32) -> (i32, i32) {
    %c1_i32 = arith.constant 1 : i32
    %0 = arith.muli %arg0, %c1_i32 : i32
    %1 = arith.addi %0, %arg1 : i32
    %c0_i32 = arith.constant 0 : i32
    %c0_i32_0 = arith.constant 0 : i32
    return %1, %c0_i32 : i32, i32
  }
  func.func @transform_2(%arg0: i32, %arg1: i32) -> (i32, i32, i32) {
    %c0_i32 = arith.constant 0 : i32
    %c0_i32_0 = arith.constant 0 : i32
    %c0_i32_1 = arith.constant 0 : i32
    return %arg0, %c0_i32, %c0_i32_0 : i32, i32, i32
  }
}

</mosaic_0001>

<bundles_post_ra>
// kernel: tpu_custom_call.1
= control target key start
LH: loop header
LB: loop body
LE: loop exit
PB: predicated region body
PF: predicated region fallthrough
CT: control target
= control target key end

     0   :  { %7 = vsyncpa [#allocation4], 0  ;;  %s718_s0 = inlined_call_operand.vmem [shape: f32[64,16], index: 0, kind: input, shape index: {}]   ;;  %s719_s1 = inlined_call_operand.vmem [shape: s32[64,1], index: 1, kind: input, shape index: {}]   ;;  %s720_s2 = inlined_call_operand.hbm [shape: f32[2,8,128], index: 2, kind: output, shape index: {}]  }
   0x1   :  { %9 = vsyncpa [#allocation4 + $0x1], 0  ;;  %s592_s9 = smov 0   ;;  %s594_s10 = smov 0  }
   0x2   :  { %s596_s11 = smov 0   ;;  %s598_s12 = smov 0  }
   0x3   :  { %s600_s13 = smov 0   ;;  %s602_s14 = smov 0  }
   0x4 LB: > { %s420_s15 = sadd.s32 4294967295, %s572_s14   ;;  %s421_s16 = sadd.s32 4294967294, %s572_s14   ;;  %s572_s14 = sphi %s602_s14, %s15_s14   ;;  %s568_s13 = sphi %s600_s13, %s727_s13   ;;  %s564_s12 = sphi %s598_s12, %s726_s12   ;;  %s560_s11 = sphi %s596_s11, %s725_s11   ;;  %s556_s10 = sphi %s594_s10, %s724_s10   ;;  %s552_s9 = sphi %s592_s9, %s723_s9  }
   0x5   : > { %s27_s17 = sadd.s32 1, %s568_s13  ;;  %s90_s18 = sadd.s32 1, %s560_s11 }
   0x6   : > { %p29_p0 = scmp.ge.s32.totalorder %s27_s17, 2  ;;  %p100_p1 = scmp.ne.s32.totalorder %s560_s11, %s556_s10 }
   0x7   : > { %p101_p2 = scmp.eq.s32.totalorder %s420_s15, 1  ;;  %p106_p3 = scmp.ne.s32.totalorder %s556_s10, %s552_s9 }
   0x8   : > { %s729_s17 = smov (%p29_p0, %s27_s17), 0  ;;  %p107_p5 = scmp.eq.s32.totalorder %s421_s16, 1 }
   0x9   : > { %p632_p4 = por %p101_p2, %p100_p1  ;;  %s87_s20 = ssub.s32 %s568_s13, %s729_s17 }
   0xa   : > { %p424_p6 = scmp.ge.s32.totalorder %s572_s14, 1  ;;  %p88_p7 = scmp.eq.s32.totalorder %s87_s20, 0 }
   0xb   : > { %p639_p8 = por %p107_p5, %p106_p3  ;;  %p147_p9 = scmp.lt.s32.totalorder %s572_s14, 3 }
   0xc   : > { %s645_s22 = scalar_select %p88_p7, %s560_s11, %s90_s18  }
   0xd   : > { %p148_p10 = pnand %p424_p6, %p147_p9 }
   0xe   : > { %s426_s23 = sshll.u32 (!%p148_p10), %s564_s12, 2  ;;  %s173_s3 = sand.u32 (!%p148_p10), 1, %s556_s10  }
   0xf   : > { %151 = sbr.rel (%p148_p10) target bundleno = 614 (0x266), region = 28  ;;  %p178_p11 = scmp.lt.s32.totalorder (!%p148_p10), %s426_s23, 7 }
  0x10   : > { %s425_s4 = sshll.u32 (!%p148_p10), %s173_s3, 3  ;;  %s435_s7 = sshll.u32 (!%p148_p10), %s564_s12, 7 }
  0x11   : > { %s175_s5 = scalar_lea.vmem (!%p148_p10), [#allocation3], %s425_s4  ;;  %s339_s16 = scalar_lea.hbm (!%p148_p10), %s720_s2, %s435_s7 }
  0x12   : > { %s341_s6 = sshll.u32 (!%p148_p10), %s175_s5, 4  ;;  %s328_s18 = scalar_lea.sflag (!%p148_p10), [#allocation4], %s173_s3  ;;  %s675_s6 = int_to_ptr.vmem [resolvable:$true] %s341_s6 }
  0x13   : > { %s496_s20 = scalar_lea.vmem (!%p148_p10), %s675_s6, 128 }
  0x14   : > { %s731_s23 = smov (!%p178_p11, %s426_s23), 7  ;;  %vm205_vm0 = vcmask 130048   ;;  %v218_v8 = vlaneseq  ;;  %v574_v46 = vmov 0   ;;  %vm300_vm10 = vcmask 7168   ;;  %p497_p12 = scmp.ne.s32.totalorder %s675_s6, %s496_s20 }
  0x15   : > { %s427_s24 = sshll.u32 %s731_s23, 3  ;;  %495 = vset.pattern.permute.xlu0 %v574_v46  ;;  %s576_s23 = smov [#allocation3]  }
  0x16   : > { %s181_s27 = scalar_lea.vmem %s718_s0, %s427_s24  ;;  %v219_v9 = vand.u32 127, %v218_v8  ;;  %s189_s30 = scalar_lea.vmem %s719_s1, %s427_s24 }
  0x17   : > { %v197_v0 = vld [vmem:[%s181_s27] sm:$0xff]  ;;  %v199_v1 = vld [vmem:[%s181_s27 + $0x10] sm:$0xff]  ;;  %v198_v2 = vld [vmem:[%s181_s27 + $0x8] sm:$0xff]  ;;  %p498_p13 = pnand %p497_p12, %p632_p4  ;;  %s500_s24 = sshll.u32 %s576_s23, 4  ;;  %s501_s24 = int_to_ptr.vmem [resolvable:$false] %s500_s24 }
  0x18   : > { %v206_v3 = vsel %vm205_vm0, %v197_v0, -inf  ;;  %v212_v4 = vsel %vm205_vm0, %v199_v1, -inf  ;;  %v200_v5 = vld [vmem:[%s181_s27 + $0x18] sm:$0xff]  ;;  %v209_v6 = vsel %vm205_vm0, %v198_v2, -inf  ;;  %v201_v53 = vld [vmem:[%s189_s30] sm:$0xff]  ;;  %v202_v62 = vld [vmem:[%s189_s30 + $0x8] sm:$0xff]  ;;  %p503_p1 = scmp.lt.s32.totalorder %s675_s6, %s501_s24 }
  0x19   : > { %207 = vmax.xlane.f32.xlu0 %v206_v3  ;;  %213 = vmax.xlane.f32.xlu1 %v212_v4  ;;  %v215_v7 = vsel %vm205_vm0, %v200_v5, -inf  ;;  %v203_v63 = vld [vmem:[%s189_s30 + $0x10] sm:$0xff]  ;;  %p499_p0 = pneg %p498_p13  ;;  %s502_s12 = scalar_lea.vmem %s501_s24, 256 }
  0x1a   : > { %p504_p2 = scmp.lt.s32.totalorder %s502_s12, %s496_s20 }
  0x1c   : > { %p505_p3 = por %p504_p2, %p503_p1 }
  0x1d   : > { %210 = vmax.xlane.f32.xlu0 %v209_v6  ;;  %216 = vmax.xlane.f32.xlu1 %v215_v7 }
  0x1e   : > { %p506_p5 = pnand %p505_p3, %p499_p0 }
  0xa2   : > { %v208_v10 = vpop.xlane.xlu0 %207  ;;  %v214_v11 = vpop.xlane.xlu1 %213 }
  0xa3   : > { %vm220_vm1 = vcmp.eq.f32.partialorder %v197_v0, %v208_v10  ;;  %vm222_vm2 = vcmp.eq.f32.partialorder %v199_v1, %v214_v11 }
  0xa4   : > { %v224_v12 = vsel %vm220_vm1, %v219_v9, 2147483647  ;;  %v226_v13 = vsel %vm222_vm2, %v219_v9, 2147483647 }
  0xa5   : > { %v228_v14 = vsel %vm205_vm0, %v224_v12, 2147483647  ;;  %v258_v15 = vsel %vm205_vm0, %v226_v13, 2147483647 }
  0xa6   : > { %v211_v16 = vpop.xlane.xlu0 %210  ;;  %v217_v17 = vpop.xlane.xlu1 %216  ;;  %v230_v18 = vshra.s32 %v228_v14, 16  ;;  %v260_v19 = vshra.s32 %v258_v15, 16  ;;  %v229_v30 = vand.u32 65535, %v228_v14  ;;  %v259_v34 = vand.u32 65535, %v258_v15 }
  0xa7   : > { %vm221_vm3 = vcmp.eq.f32.partialorder %v198_v2, %v211_v16  ;;  %vm223_vm4 = vcmp.eq.f32.partialorder %v200_v5, %v217_v17  ;;  %v575_v2 = vmov 0.0  }
  0xa8   : > { %v225_v20 = vsel %vm221_vm3, %v219_v9, 2147483647  ;;  %v227_v21 = vsel %vm223_vm4, %v219_v9, 2147483647  ;;  %v232_v22 = vcvt.s32.f32 %v230_v18  ;;  %v262_v25 = vcvt.s32.f32 %v260_v19  ;;  %v204_v9 = vld [vmem:[%s189_s30 + $0x18] sm:$0xff] }
  0xa9   : > { %v243_v23 = vsel %vm205_vm0, %v225_v20, 2147483647  ;;  %v273_v24 = vsel %vm205_vm0, %v227_v21, 2147483647  ;;  %v231_v32 = vcvt.s32.f32 %v229_v30  ;;  %v261_v39 = vcvt.s32.f32 %v259_v34 }
  0xaa   : > { %233 = vmin.xlane.f32.xlu0 %v232_v22  ;;  %v245_v26 = vshra.s32 %v243_v23, 16  ;;  %v275_v27 = vshra.s32 %v273_v24, 16  ;;  %v244_v33 = vand.u32 65535, %v243_v23  ;;  %v274_v40 = vand.u32 65535, %v273_v24 }
  0xac   : > { %v247_v28 = vcvt.s32.f32 %v245_v26  ;;  %v277_v29 = vcvt.s32.f32 %v275_v27  ;;  %v246_v38 = vcvt.s32.f32 %v244_v33  ;;  %v276_v44 = vcvt.s32.f32 %v274_v40 }
  0xae   : > { %263 = vmin.xlane.f32.xlu0 %v262_v25  ;;  %248 = vmin.xlane.f32.xlu1 %v247_v28 }
  0xb2   : > { %278 = vmin.xlane.f32.xlu1 %v277_v29 }
 0x133   : > { %v234_v31 = vpop.xlane.xlu0 %233 }
 0x134   : > { %vm235_vm5 = vcmp.eq.f32.partialorder %v232_v22, %v234_v31  ;;  %v240_v47 = vcvt.f32.s32 %v234_v31 }
 0x135   : > { %v236_v35 = vsel %vm235_vm5, %v231_v32, inf }
 0x136   : > { %237 = vmin.xlane.f32.xlu0 %v236_v35  ;;  %v241_v51 = vshll.u32 %v240_v47, 16 }
 0x137   : > { %v249_v36 = vpop.xlane.xlu1 %248  ;;  %v264_v37 = vpop.xlane.xlu0 %263 }
 0x138   : > { %vm250_vm6 = vcmp.eq.f32.partialorder %v247_v28, %v249_v36  ;;  %vm265_vm7 = vcmp.eq.f32.partialorder %v262_v25, %v264_v37  ;;  %v255_v48 = vcvt.f32.s32 %v249_v36  ;;  %v270_v49 = vcvt.f32.s32 %v264_v37 }
 0x139   : > { %v251_v41 = vsel %vm250_vm6, %v246_v38, inf  ;;  %v266_v42 = vsel %vm265_vm7, %v261_v39, inf }
 0x13a   : > { %252 = vmin.xlane.f32.xlu1 %v251_v41  ;;  %267 = vmin.xlane.f32.xlu0 %v266_v42  ;;  %v256_v55 = vshll.u32 %v255_v48, 16  ;;  %v271_v56 = vshll.u32 %v270_v49, 16 }
 0x13b   : > { %v279_v43 = vpop.xlane.xlu1 %278 }
 0x13c   : > { %vm280_vm8 = vcmp.eq.f32.partialorder %v277_v29, %v279_v43  ;;  %v285_v59 = vcvt.f32.s32 %v279_v43 }
 0x13d   : > { %v281_v45 = vsel %vm280_vm8, %v276_v44, inf }
 0x13e   : > { %282 = vmin.xlane.f32.xlu1 %v281_v45  ;;  %v286_v5 = vshll.u32 %v285_v59, 16 }
 0x1bf   : > { %v238_v50 = vpop.xlane.xlu0 %237 }
 0x1c0   : > { %v239_v52 = vcvt.f32.s32 %v238_v50 }
 0x1c2   : > { %v242_v54 = vadd.s32 %v241_v51, %v239_v52 }
 0x1c3   : > { %v253_v57 = vpop.xlane.xlu1 %252  ;;  %v268_v58 = vpop.xlane.xlu0 %267 }
 0x1c4   : > { %vm288_vm9 = vcmp.eq.s32.totalorder %v242_v54, %v201_v53  ;;  %v254_v60 = vcvt.f32.s32 %v253_v57  ;;  %v269_v61 = vcvt.f32.s32 %v268_v58 }
 0x1c5   : > { %v430_v3 = vsel %vm288_vm9, 1.0, %v575_v2 }
 0x1c6   : > { %v257_v0 = vadd.s32 %v256_v55, %v254_v60  ;;  %v272_v1 = vadd.s32 %v271_v56, %v269_v61  ;;  %v301_v10 = vsel %vm300_vm10, %v430_v3, 0.0 }
 0x1c7   : > { %v283_v4 = vpop.xlane.xlu1 %282 }
 0x1c8   : > { %vm289_vm11 = vcmp.eq.s32.totalorder %v257_v0, %v202_v62  ;;  %vm290_vm12 = vcmp.eq.s32.totalorder %v272_v1, %v203_v63  ;;  %v284_v6 = vcvt.f32.s32 %v283_v4 }
 0x1c9   : > { %v431_v7 = vsel %vm289_vm11, 1.0, %v575_v2  ;;  %v432_v8 = vsel %vm290_vm12, 1.0, %v575_v2 }
 0x1ca   : > { %v302_v11 = vsel %vm300_vm10, %v431_v7, 0.0  ;;  %v287_v12 = vadd.s32 %v286_v5, %v284_v6  ;;  %v304_v14 = vsel %vm300_vm10, %v432_v8, 0.0 }
 0x1cb   : > { %v303_v13 = vadd.f32 %v302_v11, %v301_v10 }
 0x1cc   : > { %vm291_vm13 = vcmp.eq.s32.totalorder %v287_v12, %v204_v9 }
 0x1cd   : > { %v305_v15 = vadd.f32 %v304_v14, %v303_v13  ;;  %v433_v16 = vsel %vm291_vm13, 1.0, %v575_v2 }
 0x1ce   : > { %v306_v17 = vsel %vm300_vm10, %v433_v16, 0.0 }
 0x1cf   : > { %v307_v18 = vadd.f32 %v306_v17, %v305_v15 }
 0x1d1   : > { %v308_v19 = vrot.slane %v307_v18, 4 }
 0x1d3   : > { %v309_v20 = vadd.f32 %v308_v19, %v307_v18 }
 0x1d5   : > { %v310_v21 = vrot.slane %v309_v20, 2 }
 0x1d7   : > { %v311_v22 = vadd.f32 %v310_v21, %v309_v20 }
 0x1d9   : > { %v312_v23 = vrot.slane %v311_v22, 1 }
 0x1db   : > { %v313_v24 = vadd.f32 %v312_v23, %v311_v22 }
 0x1dd   : > { %317 = vperm.xlu0 %495, %v313_v24  }
 0x258   : > { %v318_v25 = vpop.permute.xlu0 %317 }
 0x259   : > { %326 = vst [vmem:[%s175_s5] sm:$0xff] %v318_v25 }
 0x25a   : > { %509 = shalt.err (!%p506_p5)
}
 0x25b   : > { %s510_s25 = scalar_lea.hbm %s339_s16, 128  ;;  %s514_s28 = scalar_lea.hbm %s720_s2, 256 }
 0x25c   : > { %p511_p6 = scmp.ne.s32.totalorder %s339_s16, %s510_s25  ;;  %p515_p10 = scmp.lt.s32.totalorder %s339_s16, %s720_s2 }
 0x25d   : > { %p516_p11 = scmp.lt.s32.totalorder %s514_s28, %s510_s25 }
 0x25e   : > { %p512_p7 = pnand %p511_p6, %p632_p4 }
 0x25f   : > { %p517_p12 = por %p516_p11, %p515_p10 }
 0x260   : > { %p513_p9 = pneg %p512_p7 }
 0x262   : > { %p518_p13 = pnand %p517_p12, %p513_p9 }
 0x264   : > { %521 = shalt.err (!%p518_p13)
}
 0x265   : > { %438 = dma.vmem_to_hbm [thread:$0]  (%p632_p4), %s675_s6, 128, %s339_s16, %s328_s18  }
 0x266 PF: > { %p444_p0 = scmp.ge.s32.totalorder %s572_s14, 2  ;;  %s353_s3 = sand.u32 1, %s552_s9  }
 0x267   : > { %s354_s4 = scalar_lea.sflag [#allocation4], %s353_s3 }
 0x268   : > { %p441_p1 = pnand %p444_p0, %p639_p8 }
 0x26a   : > { %p442_p2 = pneg %p441_p1 }
 0x26c   : > { %547 = dma.done.wait (%p442_p2), %s354_s4, 128  }
 0x26d   : > { %549 = vsyncadd (%p442_p2), %s354_s4, 4294967168  ;;  %s15_s14 = sadd.s32 1, %s572_s14   ;;  %s723_s9 = smov %s556_s10 }
 0x26e   : > { %p12_p3 = scmp.ge.s32.totalorder %s15_s14, 4   ;;  %s724_s10 = smov %s560_s11 }
 0x26f   : > { %s725_s11 = smov %s645_s22  ;;  %s726_s12 = smov %s568_s13 }
 0x270   : > { %s727_s13 = smov %s729_s17  ;;  %14 = sbr.rel (!%p12_p3) target bundleno = 4 (0x4), region = 74 }
 0x275   :  { %359 = vsyncpa [#allocation4], 1 }
 0x276   :  { %361 = vsyncpa [#allocation4 + $0x1], 1 }

</bundles_post_ra>
